<compile_context>
chip_gen: v6e
topology: v6e:2x2x1
jax: 0.10.0
libtpu: 0.0.40
codegen_flags: <defaults>
</compile_context>

<pallas_src>
import jax
import jax.numpy as jnp
from jax.experimental import pallas as pl
from jax.experimental.pallas import tpu as pltpu


def _round_up(x, m):
    return ((x + m - 1) // m) * m


def _lora_column_parallel_kernel(x_ref, wt_ref, b_ref, am_ref, a_ref, bb_ref,
                                 o_ref, acc_ref, t_ref):
    # x_ref : (tm, tk)     wt_ref : (tk, tn)     b_ref : (1, tn)
    # am_ref: (tm, IR)     a_ref  : (tk, IR)     bb_ref: (IR, tn)
    # o_ref : (tm, tn)     acc_ref: (tm, tn) f32  t_ref: (tm, IR) f32
    j = pl.program_id(1)
    k = pl.program_id(2)
    last_k = pl.num_programs(2) - 1

    @pl.when(k == 0)
    def _init_acc():
        acc_ref[...] = jnp.zeros_like(acc_ref)

    x = x_ref[...]
    # Base projection: MXU consumes the native dtype, accumulates in f32.
    acc_ref[...] += jnp.dot(x, wt_ref[...], preferred_element_type=jnp.float32)

    # LoRA "down" projection is independent of the N tile index: compute it
    # only for j == 0 and carry the (tm, I*R) scratch across the j loop.
    @pl.when(j == 0)
    def _lora_down():
        @pl.when(k == 0)
        def _init_t():
            t_ref[...] = jnp.zeros_like(t_ref)

        t_ref[...] += jnp.dot(x, a_ref[...], preferred_element_type=jnp.float32)

        @pl.when(k == last_k)
        def _scale():
            # Fold the per-row adapter selection into the tiny intermediate
            # once; later N tiles reuse the already-scaled values.
            t_ref[...] = t_ref[...] * am_ref[...].astype(jnp.float32)

    @pl.when(k == last_k)
    def _finalize():
        # One small (tm, I*R) x (I*R, tn) "up" matmul on the MXU + bias add.
        lora = jnp.dot(t_ref[...].astype(bb_ref.dtype), bb_ref[...],
                       preferred_element_type=jnp.float32)
        out = acc_ref[...] + lora + b_ref[...].astype(jnp.float32)
        o_ref[...] = out.astype(o_ref.dtype)


def lora_column_parallel_linear(x, weight, bias, adapter_mapping, lora_As,
                                lora_Bs, *, tm=256, tn=512, tk=512):
    """Forward of LoRaColumnParallelLinear (world_size=1, skip_bias_add=False).

    Returns (output, output_bias) matching the PyTorch module's return
    signature; output_bias is None.
    """
    B, K = x.shape
    N, K2 = weight.shape
    assert K2 == K
    I, K3, R = lora_As.shape
    assert K3 == K
    assert lora_Bs.shape == (I, R, N)
    assert adapter_mapping.shape == (B, I)
    IR = I * R
    out_dtype = x.dtype

    # One-time layout plumbing in the wrapper (not per grid step):
    #   weight (N, K) -> (K, N)                : MXU-friendly, no in-kernel .T
    #   lora_As (I, K, R) -> (K, I*R)          : single "down" matmul
    #   lora_Bs (I, R, N) -> (I*R, N)          : tiles over N with the output
    #   adapter_mapping (B, I) -> (B, I*R)     : fold select into a tiny scale
    wt = weight.T
    a_all = jnp.transpose(lora_As, (1, 0, 2)).reshape(K, IR)
    b_all = lora_Bs.reshape(IR, N)
    am_exp = jnp.repeat(adapter_mapping, R, axis=1)
    bias2d = bias.reshape(1, N)

    # Clamp tile sizes to the (aligned) problem sizes.
    tm = min(tm, _round_up(B, 8))
    tn = min(tn, _round_up(N, 128))
    tk = min(tk, _round_up(K, 128))
    Bp, Np, Kp = _round_up(B, tm), _round_up(N, tn), _round_up(K, tk)

    # Zero-pad to tile multiples: keeps the K reduction exact, keeps every
    # block (8,128)-aligned; padded rows/cols are sliced off the output.
    x_p = jnp.pad(x, ((0, Bp - B), (0, Kp - K)))
    wt_p = jnp.pad(wt, ((0, Kp - K), (0, Np - N)))
    bias_p = jnp.pad(bias2d, ((0, 0), (0, Np - N)))
    am_p = jnp.pad(am_exp, ((0, Bp - B), (0, 0)))
    a_p = jnp.pad(a_all, ((0, Kp - K), (0, 0)))
    b_p = jnp.pad(b_all, ((0, 0), (0, Np - N)))

    grid = (Bp // tm, Np // tn, Kp // tk)

    itemsize = jnp.dtype(out_dtype).itemsize
    flops = 2 * B * N * K + 2 * B * K * IR + 2 * B * IR * N
    bytes_accessed = (
        x_p.size * x_p.dtype.itemsize
        + wt_p.size * wt_p.dtype.itemsize
        + bias_p.size * bias_p.dtype.itemsize
        + am_p.size * am_p.dtype.itemsize
        + a_p.size * a_p.dtype.itemsize
        + b_p.size * b_p.dtype.itemsize
        + Bp * Np * itemsize
    )

    out = pl.pallas_call(
        _lora_column_parallel_kernel,
        out_shape=jax.ShapeDtypeStruct((Bp, Np), out_dtype),
        grid_spec=pltpu.PrefetchScalarGridSpec(
            num_scalar_prefetch=0,
            grid=grid,
            in_specs=[
                pl.BlockSpec((tm, tk), lambda i, j, k: (i, k)),   # x
                pl.BlockSpec((tk, tn), lambda i, j, k: (k, j)),   # W^T
                pl.BlockSpec((1, tn), lambda i, j, k: (0, j)),    # bias slice
                pl.BlockSpec((tm, IR), lambda i, j, k: (i, 0)),   # adapter map
                pl.BlockSpec((tk, IR), lambda i, j, k: (k, 0)),   # A_all
                pl.BlockSpec((IR, tn), lambda i, j, k: (0, j)),   # B_all
            ],
            out_specs=pl.BlockSpec((tm, tn), lambda i, j, k: (i, j)),
            scratch_shapes=[
                pltpu.VMEM((tm, tn), jnp.float32),   # base accumulator
                pltpu.VMEM((tm, IR), jnp.float32),   # LoRA intermediate
            ],
        ),
        compiler_params=pltpu.CompilerParams(
            # N must be "arbitrary": the LoRA intermediate scratch is written
            # at j == 0 and reused by later N tiles of the same row block.
            dimension_semantics=("parallel", "arbitrary", "arbitrary"),
            vmem_limit_bytes=32 * 1024 * 1024,
        ),
        cost_estimate=pl.CostEstimate(
            flops=flops, transcendentals=0, bytes_accessed=bytes_accessed),
    )(x_p, wt_p, bias_p, am_p, a_p, b_p)

    out = out[:B, :N]
    # TODO(synk): gather_from_tensor_model_parallel_region (all-gather of the
    # column-parallel output) is the identity with world_size=1 and is not
    # modeled here.
    return out, None


def _reference(x, weight, bias, adapter_mapping, lora_As, lora_Bs):
    base = x @ weight.T + bias[None, :]
    lora = jnp.einsum('bk,bi,ikr,ird->bd', x, adapter_mapping, lora_As, lora_Bs)
    return base + lora


if __name__ == "__main__":
    key = jax.random.PRNGKey(0)
    k_x, k_w, k_am, k_a, k_b = jax.random.split(key, 5)

    # Small shapes consistent with the module's forward (input is [batch, hidden]).
    B = 16          # batch
    K = 512         # in_features (input_size)
    N = 512         # out_features (output_size, world_size=1 partition)
    I = 2           # number of active adapters
    R = 4           # max_r (padded LoRA rank)

    # Deterministic parameter init:
    #  - weight: xavier-normal-like (scaled gaussian), shape [N, K]
    #  - bias:   zeros (module always zero-inits the bias)
    #  - lora_As / lora_Bs: standard normal (torch.randn in update_layer)
    xavier_std = (2.0 / (K + N)) ** 0.5
    weight = jax.random.normal(k_w, (N, K), dtype=jnp.float32) * xavier_std
    bias = jnp.zeros((N,), dtype=jnp.float32)
    lora_As = jax.random.normal(k_a, (I, K, R), dtype=jnp.float32)
    lora_Bs = jax.random.normal(k_b, (I, R, N), dtype=jnp.float32)

    x = jax.random.normal(k_x, (B, K), dtype=jnp.float32)
    # adapter_mapping: per-row one-hot selection of the active adapter.
    sel = jax.random.randint(k_am, (B,), 0, I)
    adapter_mapping = jax.nn.one_hot(sel, I, dtype=jnp.float32)

    # Small tile sizes so the (M, N, K) grid has multiple tiles (here (1, 2, 2)),
    # exercising both the pl.when init/finalize path and the cross-j reuse of
    # the LoRA intermediate.
    out, out_bias = lora_column_parallel_linear(
        x, weight, bias, adapter_mapping, lora_As, lora_Bs,
        tm=256, tn=256, tk=256)
    out = jax.block_until_ready(out)

    ref = _reference(x, weight, bias, adapter_mapping, lora_As, lora_Bs)
    assert out.shape == (B, N)
    assert out.dtype == x.dtype
    assert out_bias is None
    assert jnp.allclose(out, ref, atol=1e-3, rtol=1e-3), "mismatch vs reference"

    print("KERNEL_OK")
</pallas_src>

<mosaic_0001>
module attributes {stable_mosaic.version = 11 : i64} {
  func.func @_lora_column_parallel_kernel(%arg0: i32, %arg1: i32, %arg2: i32, %arg3: memref<16x256xf32, #tpu.memory_space<vmem>>, %arg4: memref<256x256xf32, #tpu.memory_space<vmem>>, %arg5: memref<1x256xf32, #tpu.memory_space<vmem>>, %arg6: memref<16x8xf32, #tpu.memory_space<vmem>>, %arg7: memref<256x8xf32, #tpu.memory_space<vmem>>, %arg8: memref<8x256xf32, #tpu.memory_space<vmem>>, %arg9: memref<16x256xf32, #tpu.memory_space<vmem>>, %arg10: memref<16x256xf32, #tpu.memory_space<vmem>>, %arg11: memref<16x8xf32, #tpu.memory_space<vmem>>) attributes {dimension_semantics = [#tpu.dimension_semantics<parallel>, #tpu.dimension_semantics<arbitrary>, #tpu.dimension_semantics<arbitrary>], iteration_bounds = array<i64: 1, 2, 2>, scalar_prefetch = 0 : i64, scratch_operands = 2 : i64, tpu.core_type = #tpu.core_type<tc>, window_params = [{transform_indices = @transform_0, window_bounds = array<i64: 16, 256>}, {transform_indices = @transform_1, window_bounds = array<i64: 256, 256>}, {transform_indices = @transform_2, window_bounds = array<i64: 1, 256>}, {transform_indices = @transform_3, window_bounds = array<i64: 16, 8>}, {transform_indices = @transform_4, window_bounds = array<i64: 256, 8>}, {transform_indices = @transform_5, window_bounds = array<i64: 8, 256>}, {transform_indices = @transform_6, window_bounds = array<i64: 16, 256>}]} {
    %c0_i32 = arith.constant 0 : i32
    %0 = arith.cmpi eq, %arg2, %c0_i32 : i32
    %1 = arith.extui %0 : i1 to i32
    %c0_i32_0 = arith.constant 0 : i32
    %2 = arith.cmpi ne, %1, %c0_i32_0 : i32
    scf.if %2 {
      %cst_11 = arith.constant 0.000000e+00 : f32
      %15 = vector.broadcast %cst_11 : f32 to vector<16x256xf32>
      %c0_12 = arith.constant 0 : index
      %c0_13 = arith.constant 0 : index
      %16 = vector.load %arg10[%c0_12, %c0_13] : memref<16x256xf32, #tpu.memory_space<vmem>>, vector<16x256xf32>
      tpu.vector_store %arg10[%c0_12, %c0_13], %15 {strides = array<i32>} : memref<16x256xf32, #tpu.memory_space<vmem>>, vector<16x256xf32>,
    } else {
    }
    %c0 = arith.constant 0 : index
    %c0_1 = arith.constant 0 : index
    %3 = vector.load %arg3[%c0, %c0_1] : memref<16x256xf32, #tpu.memory_space<vmem>>, vector<16x256xf32>
    %c0_2 = arith.constant 0 : index
    %c0_3 = arith.constant 0 : index
    %4 = vector.load %arg10[%c0_2, %c0_3] : memref<16x256xf32, #tpu.memory_space<vmem>>, vector<16x256xf32>
    %c0_4 = arith.constant 0 : index
    %c0_5 = arith.constant 0 : index
    %5 = vector.load %arg4[%c0_4, %c0_5] : memref<256x256xf32, #tpu.memory_space<vmem>>, vector<256x256xf32>
    %cst = arith.constant dense<0.000000e+00> : vector<16x256xf32>
    %6 = tpu.matmul %3, %5, %cst {dimension_numbers = #tpu.dot_dimension_numbers<[1], [0], [0], [1], [0, 0, 1, 1], [], []>} : vector<16x256xf32>, vector<256x256xf32>, vector<16x256xf32> -> vector<16x256xf32>
    %7 = arith.addf %4, %6 : vector<16x256xf32>
    %c0_6 = arith.constant 0 : index
    %c0_7 = arith.constant 0 : index
    %8 = vector.load %arg10[%c0_6, %c0_7] : memref<16x256xf32, #tpu.memory_space<vmem>>, vector<16x256xf32>
    tpu.vector_store %arg10[%c0_6, %c0_7], %7 {strides = array<i32>} : memref<16x256xf32, #tpu.memory_space<vmem>>, vector<16x256xf32>,
    %c0_i32_8 = arith.constant 0 : i32
    %9 = arith.cmpi eq, %arg1, %c0_i32_8 : i32
    %10 = arith.extui %9 : i1 to i32
    %c0_i32_9 = arith.constant 0 : i32
    %11 = arith.cmpi ne, %10, %c0_i32_9 : i32
    scf.if %11 {
      %c0_i32_11 = arith.constant 0 : i32
      %15 = arith.cmpi eq, %arg2, %c0_i32_11 : i32
      %16 = arith.extui %15 : i1 to i32
      %c0_i32_12 = arith.constant 0 : i32
      %17 = arith.cmpi ne, %16, %c0_i32_12 : i32
      scf.if %17 {
        %cst_22 = arith.constant 0.000000e+00 : f32
        %26 = vector.broadcast %cst_22 : f32 to vector<16x8xf32>
        %c0_23 = arith.constant 0 : index
        %c0_24 = arith.constant 0 : index
        %27 = vector.load %arg11[%c0_23, %c0_24] : memref<16x8xf32, #tpu.memory_space<vmem>>, vector<16x8xf32>
        tpu.vector_store %arg11[%c0_23, %c0_24], %26 {strides = array<i32>} : memref<16x8xf32, #tpu.memory_space<vmem>>, vector<16x8xf32>,
      } else {
      }
      %c0_13 = arith.constant 0 : index
      %c0_14 = arith.constant 0 : index
      %18 = vector.load %arg11[%c0_13, %c0_14] : memref<16x8xf32, #tpu.memory_space<vmem>>, vector<16x8xf32>
      %c0_15 = arith.constant 0 : index
      %c0_16 = arith.constant 0 : index
      %19 = vector.load %arg7[%c0_15, %c0_16] : memref<256x8xf32, #tpu.memory_space<vmem>>, vector<256x8xf32>
      %cst_17 = arith.constant dense<0.000000e+00> : vector<16x8xf32>
      %20 = tpu.matmul %3, %19, %cst_17 {dimension_numbers = #tpu.dot_dimension_numbers<[1], [0], [0], [1], [0, 0, 1, 1], [], []>} : vector<16x256xf32>, vector<256x8xf32>, vector<16x8xf32> -> vector<16x8xf32>
      %21 = arith.addf %18, %20 : vector<16x8xf32>
      %c0_18 = arith.constant 0 : index
      %c0_19 = arith.constant 0 : index
      %22 = vector.load %arg11[%c0_18, %c0_19] : memref<16x8xf32, #tpu.memory_space<vmem>>, vector<16x8xf32>
      tpu.vector_store %arg11[%c0_18, %c0_19], %21 {strides = array<i32>} : memref<16x8xf32, #tpu.memory_space<vmem>>, vector<16x8xf32>,
      %c1_i32_20 = arith.constant 1 : i32
      %23 = arith.cmpi eq, %arg2, %c1_i32_20 : i32
      %24 = arith.extui %23 : i1 to i32
      %c0_i32_21 = arith.constant 0 : i32
      %25 = arith.cmpi ne, %24, %c0_i32_21 : i32
      scf.if %25 {
        %c0_22 = arith.constant 0 : index
        %c0_23 = arith.constant 0 : index
        %26 = vector.load %arg11[%c0_22, %c0_23] : memref<16x8xf32, #tpu.memory_space<vmem>>, vector<16x8xf32>
        %c0_24 = arith.constant 0 : index
        %c0_25 = arith.constant 0 : index
        %27 = vector.load %arg6[%c0_24, %c0_25] : memref<16x8xf32, #tpu.memory_space<vmem>>, vector<16x8xf32>
        %28 = arith.mulf %26, %27 : vector<16x8xf32>
        %c0_26 = arith.constant 0 : index
        %c0_27 = arith.constant 0 : index
        %29 = vector.load %arg11[%c0_26, %c0_27] : memref<16x8xf32, #tpu.memory_space<vmem>>, vector<16x8xf32>
        tpu.vector_store %arg11[%c0_26, %c0_27], %28 {strides = array<i32>} : memref<16x8xf32, #tpu.memory_space<vmem>>, vector<16x8xf32>,
      } else {
      }
    } else {
    }
    %c1_i32 = arith.constant 1 : i32
    %12 = arith.cmpi eq, %arg2, %c1_i32 : i32
    %13 = arith.extui %12 : i1 to i32
    %c0_i32_10 = arith.constant 0 : i32
    %14 = arith.cmpi ne, %13, %c0_i32_10 : i32
    scf.if %14 {
      %c0_11 = arith.constant 0 : index
      %c0_12 = arith.constant 0 : index
      %15 = vector.load %arg11[%c0_11, %c0_12] : memref<16x8xf32, #tpu.memory_space<vmem>>, vector<16x8xf32>
      %c0_13 = arith.constant 0 : index
      %c0_14 = arith.constant 0 : index
      %16 = vector.load %arg8[%c0_13, %c0_14] : memref<8x256xf32, #tpu.memory_space<vmem>>, vector<8x256xf32>
      %cst_15 = arith.constant dense<0.000000e+00> : vector<16x256xf32>
      %17 = tpu.matmul %15, %16, %cst_15 {dimension_numbers = #tpu.dot_dimension_numbers<[1], [0], [0], [1], [0, 0, 1, 1], [], []>} : vector<16x8xf32>, vector<8x256xf32>, vector<16x256xf32> -> vector<16x256xf32>
      %c0_16 = arith.constant 0 : index
      %c0_17 = arith.constant 0 : index
      %18 = vector.load %arg10[%c0_16, %c0_17] : memref<16x256xf32, #tpu.memory_space<vmem>>, vector<16x256xf32>
      %19 = arith.addf %18, %17 : vector<16x256xf32>
      %c0_18 = arith.constant 0 : index
      %c0_19 = arith.constant 0 : index
      %20 = vector.load %arg5[%c0_18, %c0_19] : memref<1x256xf32, #tpu.memory_space<vmem>>, vector<1x256xf32>
      %21 = vector.broadcast %20 : vector<1x256xf32> to vector<16x256xf32>
      %22 = arith.addf %19, %21 : vector<16x256xf32>
      %c0_20 = arith.constant 0 : index
      %c0_21 = arith.constant 0 : index
      %23 = vector.load %arg9[%c0_20, %c0_21] : memref<16x256xf32, #tpu.memory_space<vmem>>, vector<16x256xf32>
      tpu.vector_store %arg9[%c0_20, %c0_21], %22 {strides = array<i32>} : memref<16x256xf32, #tpu.memory_space<vmem>>, vector<16x256xf32>,
    } else {
    }
    return
  }
  func.func @transform_0(%arg0: i32, %arg1: i32, %arg2: i32) -> (i32, i32) {
    %c0_i32 = arith.constant 0 : i32
    return %arg0, %arg2 : i32, i32
  }
  func.func @transform_1(%arg0: i32, %arg1: i32, %arg2: i32) -> (i32, i32) {
    %c0_i32 = arith.constant 0 : i32
    return %arg2, %arg1 : i32, i32
  }
  func.func @transform_2(%arg0: i32, %arg1: i32, %arg2: i32) -> (i32, i32) {
    %c0_i32 = arith.constant 0 : i32
    %c0_i32_0 = arith.constant 0 : i32
    return %c0_i32, %arg1 : i32, i32
  }
  func.func @transform_3(%arg0: i32, %arg1: i32, %arg2: i32) -> (i32, i32) {
    %c0_i32 = arith.constant 0 : i32
    %c0_i32_0 = arith.constant 0 : i32
    return %arg0, %c0_i32 : i32, i32
  }
  func.func @transform_4(%arg0: i32, %arg1: i32, %arg2: i32) -> (i32, i32) {
    %c0_i32 = arith.constant 0 : i32
    %c0_i32_0 = arith.constant 0 : i32
    return %arg2, %c0_i32 : i32, i32
  }
  func.func @transform_5(%arg0: i32, %arg1: i32, %arg2: i32) -> (i32, i32) {
    %c0_i32 = arith.constant 0 : i32
    %c0_i32_0 = arith.constant 0 : i32
    return %c0_i32, %arg1 : i32, i32
  }
  func.func @transform_6(%arg0: i32, %arg1: i32, %arg2: i32) -> (i32, i32) {
    %c0_i32 = arith.constant 0 : i32
    return %arg0, %arg1 : i32, i32
  }
}

</mosaic_0001>

<bundles_post_ra>
// kernel: tpu_custom_call.1
= control target key start
LH: loop header
LB: loop body
LE: loop exit
PB: predicated region body
PF: predicated region fallthrough
CT: control target
= control target key end

     0   :  { %s1940_s0 = inlined_call_operand.vmem [shape: f32[16,512], index: 0, kind: input, shape index: {}]   ;;  %s1941_s1 = inlined_call_operand.hbm [shape: f32[512,512], index: 1, kind: input, shape index: {}]   ;;  %s1942_s2 = inlined_call_operand.vmem [shape: f32[1,512], index: 2, kind: input, shape index: {}]   ;;  %s1943_s3 = inlined_call_operand.vmem [shape: f32[16,8], index: 3, kind: input, shape index: {}]   ;;  %s1944_s4 = inlined_call_operand.vmem [shape: f32[512,8], index: 4, kind: input, shape index: {}]   ;;  %s1945_s5 = inlined_call_operand.vmem [shape: f32[8,512], index: 5, kind: input, shape index: {}]   ;;  %s1946_s6 = inlined_call_operand.hbm [shape: f32[16,512], index: 6, kind: output, shape index: {}]  }
   0x1   :  { %1956 = sst [smem:[#allocation21_spill]] %s1940_s0 }
   0x2   :  { %1957 = sst [smem:[#allocation22_spill]] %s1943_s3 }
   0x3   :  { %1958 = sst [smem:[#allocation23_spill]] %s1946_s6 }
   0x4   :  { %11 = vsyncpa [#allocation6], 0 }
   0x5   :  { %13 = vsyncpa [#allocation6 + $0x1], 0 }
   0x6   :  { %14 = vsyncpa [#allocation7], 0 }
   0x7   :  { %16 = vsyncpa [#allocation7 + $0x1], 0  ;;  %s1543_s21 = smov 0   ;;  %s1545_s22 = smov 0  }
   0x8   :  { %s1547_s23 = smov 0   ;;  %s1549_s24 = smov 0  }
   0x9   :  { %s1551_s25 = smov 0   ;;  %s1553_s26 = smov 0  }
   0xa   :  { %s1555_s27 = smov 0   ;;  %s1557_s28 = smov 0  }
   0xb   :  { %s1559_s29 = smov 0   ;;  %s1561_s30 = smov 0  }
   0xc   :  { %s1563_s7 = smov 0   ;;  %s1565_s8 = smov 0  }
   0xd   :  { %s1567_s9 = smov 0  }
   0xe LB: > { %1959 = sst [smem:[#allocation11_spill]] %s1455_s23  ;;  %s1038_s10 = sadd.s32 4294967295, %s1495_s9   ;;  %s1495_s9 = sphi %s1567_s9, %s22_s9   ;;  %s1491_s8 = sphi %s1565_s8, %s1988_s8   ;;  %s1487_s7 = sphi %s1563_s7, %s1994_s7   ;;  %s1483_s30 = sphi %s1561_s30, %s1986_s30   ;;  %s1479_s29 = sphi %s1559_s29, %s1993_s29   ;;  %s1475_s28 = sphi %s1557_s28, %s1985_s28   ;;  %s1471_s27 = sphi %s1555_s27, %s1984_s27   ;;  %s1467_s26 = sphi %s1553_s26, %s1983_s26   ;;  %s1463_s25 = sphi %s1551_s25, %s1992_s25   ;;  %s1459_s24 = sphi %s1549_s24, %s1991_s24   ;;  %s1455_s23 = sphi %s1547_s23, %s1981_s23   ;;  %s1451_s22 = sphi %s1545_s22, %s1990_s22   ;;  %s1447_s21 = sphi %s1543_s21, %s1989_s21  }
   0xf   : > { %1960 = sst [smem:[#allocation12_spill]] %s1467_s26  ;;  %s34_s12 = sadd.s32 1, %s1487_s7 }
  0x10   : > { %1961 = sst [smem:[#allocation13_spill]] %s1475_s28  ;;  %s37_s13 = sadd.s32 1, %s1491_s8 }
  0x11   : > { %1962 = sst [smem:[#allocation14_spill]] %s1491_s8  ;;  %p35_p0 = scmp.ge.s32.totalorder %s34_s12, 2 }
  0x12   : > { %s50_s14 = sadd.s32 1, %s1475_s28  ;;  %p57_p1 = scmp.ne.s32.totalorder %s1475_s28, %s1471_s27 }
  0x13   : > { %p58_p2 = scmp.eq.s32.totalorder %s1495_s9, 0  ;;  %s1996_s12 = smov (%p35_p0, %s34_s12), 0 }
  0x14   : > { %1963 = sst [smem:[#allocation15_spill]] %s1996_s12  ;;  %s1998_s13 = smov (!%p35_p0, %s37_s13), %s1491_s8 }
  0x15   : > { %s46_s15 = ssub.s32 %s1487_s7, %s1996_s12  ;;  %p1621_p3 = por %p58_p2, %p57_p1 }
  0x16   : > { %p39_p4 = scmp.ge.s32.totalorder %s1998_s13, 2  ;;  %p48_p5 = scmp.eq.s32.totalorder %s46_s15, 0 }
  0x17   : > { %s78_s17 = sadd.s32 1, %s1467_s26  ;;  %p85_p6 = scmp.ne.s32.totalorder %s1467_s26, %s1463_s25 }
  0x18   : > { %s2000_s13 = smov (%p39_p4, %s1998_s13), 0  ;;  %p91_p8 = scmp.ne.s32.totalorder %s1463_s25, %s1459_s24 }
  0x19   : > { %1965 = sst [smem:[#allocation16_spill]] %s2000_s13  ;;  %s74_s19 = ssub.s32 %s1491_s8, %s2000_s13 }
  0x1a   : > { %s1631_s18 = scalar_select %p48_p5, %s1475_s28, %s50_s14  }
  0x1b   : > { %p1635_p7 = por %p85_p6, %p58_p2  ;;  %s75_s11 = sor.u32 %s74_s19, %s46_s15 }
  0x1c   : > { %1966 = sst [smem:[#allocation17_spill]] %s1631_s18  ;;  %p76_p9 = scmp.eq.s32.totalorder %s75_s11, 0 }
  0x1d   : > { %p92_p10 = scmp.eq.s32.totalorder %s1038_s10, 0  ;;  %p208_p11 = scmp.eq.s32.totalorder %s74_s19, 0 }
  0x1e   : > { %s210_s12 = sadd.s32 1, %s1455_s23  ;;  %p220_p13 = scmp.ne.s32.totalorder %s1455_s23, %s1451_s22 }
  0x1f   : > { %s1645_s6 = scalar_select %p76_p9, %s1467_s26, %s78_s17  }
  0x20   : > { %p1647_p12 = por %p92_p10, %p91_p8  ;;  %p221_p0 = scmp.eq.s32.totalorder %s1038_s10, 3 }
  0x21   : > { %1968 = sst [smem:[#allocation18_spill]] %s1645_s6  ;;  %p226_p1 = scmp.ne.s32.totalorder %s1451_s22, %s1447_s21 }
  0x22   : > { %s1654_s14 = scalar_select %p208_p11, %s1455_s23, %s210_s12  }
  0x23   : > { %s1971_s13 = sadd.s32 4294967294, %s1495_s9   ;;  %p1662_p4 = por %p221_p0, %p220_p13 }
  0x24   : > { %1970 = sst [smem:[#allocation19_spill]] %s1654_s14  ;;  %p227_p2 = scmp.eq.s32.totalorder %s1971_s13, 3 }
  0x25   : > { %p1042_p6 = scmp.ge.s32.totalorder %s1495_s9, 4 }
  0x26   : > { %p1666_p5 = por %p227_p2, %p226_p1 }
  0x27   : > { %252 = sbr.rel (%p1042_p6) target bundleno = 74 (0x4a), region = 20 }
  0x28   : > { %s1973_s11 = scalar_select %p1666_p5, 1, 0 }
  0x2a   : > { %1974 = sst [smem:[#allocation20_spill]] %s1973_s11 }
  0x2c   : > { %255 = sbr.rel (!%p1621_p3) target bundleno = 56 (0x38), region = 24  ;;  %s257_s10 = sand.u32 (%p1621_p3), 1, %s1475_s28  }
  0x2d   : > { %s1072_s12 = sshll.u32 (%p1621_p3), %s1487_s7, 4  ;;  %s1043_s15 = sshll.u32 (%p1621_p3), %s257_s10, 5 }
  0x2e   : > { %s1975_s0 = sld [smem:[#allocation21_spill]] (%p1621_p3)  ;;  %s259_s18 = scalar_lea.vmem (%p1621_p3), [#allocation4], %s1043_s15 }
  0x34   : > { %s265_s19 = scalar_lea.vmem %s1975_s0, %s1072_s12 }
  0x35   : > { %v278_v0 = vld [vmem:[%s265_s19] sm:$0xff]  ;;  %v280_v1 = vld [vmem:[%s265_s19 + $0x8] sm:$0xff] }
  0x36   : > { %v282_v2 = vld [vmem:[%s265_s19 + $0x20] sm:$0xff]  ;;  %279 = vst [vmem:[%s259_s18] sm:$0xff] %v278_v0  ;;  %281 = vst [vmem:[%s259_s18 + $0x8] sm:$0xff] %v280_v1  ;;  %v284_v3 = vld [vmem:[%s265_s19 + $0x28] sm:$0xff] }
  0x37   : > { %283 = vst [vmem:[%s259_s18 + $0x10] sm:$0xff] %v282_v2  ;;  %285 = vst [vmem:[%s259_s18 + $0x18] sm:$0xff] %v284_v3 }
  0x38 PF: > { %s292_s16 = sand.u32 1, %s1467_s26   ;;  %s1048_s10 = sshll.u32 %s1491_s8, 1 }
  0x39   : > { %s1046_s28 = sshll.u32 %s292_s16, 9  ;;  %s1073_s6 = sshll.u32 %s1487_s7, 7 }
  0x3a   : > { %s303_s13 = sadd.s32 %s1073_s6, %s1048_s10  ;;  %s296_s12 = scalar_lea.vmem [#allocation5], %s1046_s28 }
  0x3b   : > { %s306_s17 = sshll.u32 %s296_s12, 4  ;;  %s1050_s0 = sshll.u32 %s303_s13, 7  ;;  %s307_s17 = int_to_ptr.vmem [resolvable:$true] %s306_s17 }
  0x3c   : > { %s305_s23 = scalar_lea.hbm %s1941_s1, %s1050_s0  ;;  %s293_s19 = scalar_lea.sflag [#allocation6], %s292_s16 }
  0x3d   : > { %s1345_s18 = scalar_lea.vmem %s307_s17, 8192  ;;  %s1497_s11 = smov [#allocation5]  }
  0x3e   : > { %p1346_p3 = scmp.ne.s32.totalorder %s307_s17, %s1345_s18  ;;  %s1349_s26 = sshll.u32 %s1497_s11, 4  ;;  %s1350_s26 = int_to_ptr.vmem [resolvable:$false] %s1349_s26 }
  0x3f   : > { %s1351_s8 = scalar_lea.vmem %s1350_s26, 16384  ;;  %p1352_p10 = scmp.lt.s32.totalorder %s307_s17, %s1350_s26 }
  0x40   : > { %p1347_p8 = pnand %p1346_p3, %p1635_p7  ;;  %p1353_p11 = scmp.lt.s32.totalorder %s1351_s8, %s1345_s18 }
  0x42   : > { %p1348_p9 = pneg %p1347_p8  ;;  %p1354_p13 = por %p1353_p11, %p1352_p10 }
  0x44   : > { %p1355_p0 = pnand %p1354_p13, %p1348_p9 }
  0x46   : > { %1358 = shalt.err (!%p1355_p0)
}
  0x47   : > { %s1498_s6 = smov 512   ;;  %s1499_s28 = smov 256  }
  0x48   : > { %s1500_s14 = smov 16  }
  0x49   : > { %1211 = dma.hbm_to_vmem [thread:$0]  (%p1635_p7), %s305_s23, 8192, %s307_s17, %s293_s19, %s1498_s6, %s1499_s28, %s1500_s14  }
  0x4a PF: > { %p1051_p1 = scmp.ge.s32.totalorder %s1495_s9, 1  ;;  %p340_p2 = scmp.lt.s32.totalorder %s1495_s9, 5 }
  0x4c   : > { %p341_p6 = pnand %p1051_p1, %p340_p2 }
  0x4d   : > { %s347_s0 = sand.u32 (!%p341_p6), 1, %s1471_s27   ;;  %s353_s26 = sand.u32 (!%p341_p6), 1, %s1463_s25  }
  0x4e   : > { %344 = sbr.rel (%p341_p6) target bundleno = 850 (0x352), region = 63  ;;  %s1052_s8 = sshll.u32 (!%p341_p6), %s347_s0, 5 }
  0x4f   : > { %s1053_s11 = sshll.u32 (!%p341_p6), %s353_s26, 9  ;;  %s1692_s16 = scalar_lea.vmem (!%p341_p6), [#allocation4], %s1052_s8 }
  0x50   : > { %s354_s10 = scalar_lea.sflag (!%p341_p6), [#allocation6], %s353_s26  ;;  %s1694_s13 = scalar_lea.vmem (!%p341_p6), [#allocation5], %s1053_s11 }
  0x53   : > { %1438 = dma.done.wait (%p1647_p12), %s354_s10, 8192  }
  0x54   : > { %1440 = vsyncadd (%p1647_p12), %s354_s10, 4294959104  ;;  %s406_s23 = sand.u32 1, %s1451_s22   ;;  %s1055_s20 = sshll.u32 %s1483_s30, 1 }
  0x55   : > { %s1054_s27 = sshll.u32 %s406_s23, 5  ;;  %p414_p7 = scmp.lt.s32.totalorder %s1055_s20, 3 }
  0x56   : > { %s1056_s12 = sshll.u32 %s1479_s29, 5  ;;  %s1722_s11 = scalar_lea.vmem [#allocation8], %s1054_s27 }
  0x57   : > { %s2002_s20 = smov (!%p414_p7, %s1055_s20), 3  ;;  %p425_p3 = scmp.lt.s32.totalorder %s1056_s12, 63 }
  0x58   : > { %s416_s3 = scalar_lea.vmem %s1942_s2, %s2002_s20  ;;  %s1059_s19 = sshll.u32 %s2002_s20, 3 }
  0x59   : > { %s2004_s12 = smov (!%p425_p3, %s1056_s12), 63  ;;  %s1715_s28 = scalar_lea.vmem %s1945_s5, %s1059_s19 }
  0x5a   : > { %s1057_s14 = sshll.u32 %s2004_s12, 3  ;;  %p1060_p12 = scmp.ne.s32.totalorder %s1479_s29, 0 }
  0x5b   : > { %s1720_s8 = scalar_lea.vmem %s1944_s4, %s1057_s14 }
  0x5c   : > { %441 = sbr.rel (%p1060_p12) target bundleno = 100 (0x64), region = 75 }
  0x61   : > { %v1501_v4 = vmov 0.0  }
  0x62   : > { %442 = vst [vmem:[#allocation2 + $0x10] sm:$0xff] %v1501_v4  ;;  %443 = vst [vmem:[#allocation2] sm:$0xff] %v1501_v4 }
  0x63   : > { %444 = vst [vmem:[#allocation2 + $0x18] sm:$0xff] %v1501_v4  ;;  %445 = vst [vmem:[#allocation2 + $0x8] sm:$0xff] %v1501_v4 }
  0x64 PF: > { %v485_v5 = vld [vmem:[%s1694_s13 + $0xf8] sm:$0xff]  ;;  %v484_v6 = vld [vmem:[%s1694_s13 + $0xf0] sm:$0xff]  ;;  %v483_v7 = vld [vmem:[%s1694_s13 + $0xe8] sm:$0xff]  ;;  %p1061_p8 = scmp.ne.s32.totalorder %s1483_s30, 0 }
  0x65   : > { %518 = vmatprep.subr.mxu0 %v485_v5  ;;  %1113 = vmatprep.subr.mxu1 %v485_v5  ;;  %v482_v8 = vld [vmem:[%s1694_s13 + $0xe0] sm:$0xff]  ;;  %v481_v9 = vld [vmem:[%s1694_s13 + $0xd8] sm:$0xff]  ;;  %v480_v10 = vld [vmem:[%s1694_s13 + $0xd0] sm:$0xff] }
  0x66   : > { %519 = vmatpush1.msra.mxu0 %v484_v6  ;;  %1145 = vmatpush1.msra.mxu1 %v484_v6  ;;  %v479_v11 = vld [vmem:[%s1694_s13 + $0xc8] sm:$0xff]  ;;  %v478_v12 = vld [vmem:[%s1694_s13 + $0xc0] sm:$0xff]  ;;  %v477_v13 = vld [vmem:[%s1694_s13 + $0xb8] sm:$0xff] }
  0x67   : > { %520 = vmatprep.subr.mxu0 %v483_v7  ;;  %1114 = vmatprep.subr.mxu1 %v483_v7  ;;  %v476_v14 = vld [vmem:[%s1694_s13 + $0xb0] sm:$0xff]  ;;  %v475_v15 = vld [vmem:[%s1694_s13 + $0xa8] sm:$0xff]  ;;  %v474_v16 = vld [vmem:[%s1694_s13 + $0xa0] sm:$0xff] }
  0x68   : > { %521 = vmatpush1.msra.mxu0 %v482_v8  ;;  %1146 = vmatpush1.msra.mxu1 %v482_v8  ;;  %v473_v17 = vld [vmem:[%s1694_s13 + $0x98] sm:$0xff]  ;;  %v472_v18 = vld [vmem:[%s1694_s13 + $0x90] sm:$0xff]  ;;  %v471_v19 = vld [vmem:[%s1694_s13 + $0x88] sm:$0xff] }
  0x69   : > { %522 = vmatprep.subr.mxu0 %v481_v9  ;;  %1115 = vmatprep.subr.mxu1 %v481_v9  ;;  %v470_v20 = vld [vmem:[%s1694_s13 + $0x80] sm:$0xff]  ;;  %v469_v21 = vld [vmem:[%s1694_s13 + $0x78] sm:$0xff]  ;;  %v468_v22 = vld [vmem:[%s1694_s13 + $0x70] sm:$0xff] }
  0x6a   : > { %523 = vmatpush1.msra.mxu0 %v480_v10  ;;  %1147 = vmatpush1.msra.mxu1 %v480_v10  ;;  %v467_v23 = vld [vmem:[%s1694_s13 + $0x68] sm:$0xff]  ;;  %v466_v24 = vld [vmem:[%s1694_s13 + $0x60] sm:$0xff]  ;;  %v465_v25 = vld [vmem:[%s1694_s13 + $0x58] sm:$0xff] }
  0x6b   : > { %524 = vmatprep.subr.mxu0 %v479_v11  ;;  %1116 = vmatprep.subr.mxu1 %v479_v11  ;;  %v464_v26 = vld [vmem:[%s1694_s13 + $0x50] sm:$0xff]  ;;  %v463_v27 = vld [vmem:[%s1694_s13 + $0x48] sm:$0xff]  ;;  %v462_v28 = vld [vmem:[%s1694_s13 + $0x40] sm:$0xff] }
  0x6c   : > { %525 = vmatpush1.msra.mxu0 %v478_v12  ;;  %1148 = vmatpush1.msra.mxu1 %v478_v12  ;;  %v461_v29 = vld [vmem:[%s1694_s13 + $0x38] sm:$0xff]  ;;  %v460_v30 = vld [vmem:[%s1694_s13 + $0x30] sm:$0xff]  ;;  %v459_v31 = vld [vmem:[%s1694_s13 + $0x28] sm:$0xff] }
  0x6d   : > { %526 = vmatprep.subr.mxu0 %v477_v13  ;;  %1117 = vmatprep.subr.mxu1 %v477_v13  ;;  %v458_v32 = vld [vmem:[%s1694_s13 + $0x20] sm:$0xff]  ;;  %v457_v33 = vld [vmem:[%s1694_s13 + $0x18] sm:$0xff]  ;;  %v456_v34 = vld [vmem:[%s1694_s13 + $0x10] sm:$0xff] }
  0x6e   : > { %527 = vmatpush1.msra.mxu0 %v476_v14  ;;  %1149 = vmatpush1.msra.mxu1 %v476_v14  ;;  %v455_v35 = vld [vmem:[%s1694_s13 + $0x8] sm:$0xff]  ;;  %v454_v36 = vld [vmem:[%s1694_s13] sm:$0xff]  ;;  %v517_v37 = vld [vmem:[%s1694_s13 + $0x1f8] sm:$0xff] }
  0x6f   : > { %528 = vmatprep.subr.mxu0 %v475_v15  ;;  %1118 = vmatprep.subr.mxu1 %v475_v15  ;;  %v516_v38 = vld [vmem:[%s1694_s13 + $0x1f0] sm:$0xff]  ;;  %v515_v39 = vld [vmem:[%s1694_s13 + $0x1e8] sm:$0xff]  ;;  %v514_v40 = vld [vmem:[%s1694_s13 + $0x1e0] sm:$0xff] }
  0x70   : > { %529 = vmatpush1.msra.mxu0 %v474_v16  ;;  %1150 = vmatpush1.msra.mxu1 %v474_v16  ;;  %v513_v41 = vld [vmem:[%s1694_s13 + $0x1d8] sm:$0xff]  ;;  %v512_v42 = vld [vmem:[%s1694_s13 + $0x1d0] sm:$0xff]  ;;  %v511_v43 = vld [vmem:[%s1694_s13 + $0x1c8] sm:$0xff] }
  0x71   : > { %530 = vmatprep.subr.mxu0 %v473_v17  ;;  %1119 = vmatprep.subr.mxu1 %v473_v17  ;;  %v510_v44 = vld [vmem:[%s1694_s13 + $0x1c0] sm:$0xff]  ;;  %v509_v45 = vld [vmem:[%s1694_s13 + $0x1b8] sm:$0xff]  ;;  %v508_v46 = vld [vmem:[%s1694_s13 + $0x1b0] sm:$0xff] }
  0x72   : > { %531 = vmatpush1.msra.mxu0 %v472_v18  ;;  %1151 = vmatpush1.msra.mxu1 %v472_v18  ;;  %v507_v47 = vld [vmem:[%s1694_s13 + $0x1a8] sm:$0xff]  ;;  %v506_v48 = vld [vmem:[%s1694_s13 + $0x1a0] sm:$0xff]  ;;  %v505_v49 = vld [vmem:[%s1694_s13 + $0x198] sm:$0xff] }
  0x73   : > { %532 = vmatprep.subr.mxu0 %v471_v19  ;;  %1120 = vmatprep.subr.mxu1 %v471_v19  ;;  %v504_v50 = vld [vmem:[%s1694_s13 + $0x190] sm:$0xff]  ;;  %v503_v51 = vld [vmem:[%s1694_s13 + $0x188] sm:$0xff]  ;;  %v502_v52 = vld [vmem:[%s1694_s13 + $0x180] sm:$0xff] }
  0x74   : > { %533 = vmatpush1.msra.mxu0 %v470_v20  ;;  %1152 = vmatpush1.msra.mxu1 %v470_v20  ;;  %v501_v53 = vld [vmem:[%s1694_s13 + $0x178] sm:$0xff]  ;;  %v500_v54 = vld [vmem:[%s1694_s13 + $0x170] sm:$0xff]  ;;  %v499_v55 = vld [vmem:[%s1694_s13 + $0x168] sm:$0xff] }
  0x75   : > { %534 = vmatprep.subr.mxu0 %v469_v21  ;;  %1121 = vmatprep.subr.mxu1 %v469_v21  ;;  %v498_v56 = vld [vmem:[%s1694_s13 + $0x160] sm:$0xff]  ;;  %v497_v57 = vld [vmem:[%s1694_s13 + $0x158] sm:$0xff]  ;;  %v496_v58 = vld [vmem:[%s1694_s13 + $0x150] sm:$0xff] }
  0x76   : > { %535 = vmatpush1.msra.mxu0 %v468_v22  ;;  %1153 = vmatpush1.msra.mxu1 %v468_v22  ;;  %v495_v59 = vld [vmem:[%s1694_s13 + $0x148] sm:$0xff]  ;;  %v494_v60 = vld [vmem:[%s1694_s13 + $0x140] sm:$0xff]  ;;  %v493_v61 = vld [vmem:[%s1694_s13 + $0x138] sm:$0xff] }
  0x77   : > { %536 = vmatprep.subr.mxu0 %v467_v23  ;;  %1122 = vmatprep.subr.mxu1 %v467_v23  ;;  %v492_v62 = vld [vmem:[%s1694_s13 + $0x130] sm:$0xff]  ;;  %v491_v63 = vld [vmem:[%s1694_s13 + $0x128] sm:$0xff]  ;;  %v490_v0 = vld [vmem:[%s1694_s13 + $0x120] sm:$0xff] }
  0x78   : > { %537 = vmatpush1.msra.mxu0 %v466_v24  ;;  %1154 = vmatpush1.msra.mxu1 %v466_v24  ;;  %v489_v1 = vld [vmem:[%s1694_s13 + $0x118] sm:$0xff]  ;;  %v488_v2 = vld [vmem:[%s1694_s13 + $0x110] sm:$0xff]  ;;  %v487_v3 = vld [vmem:[%s1694_s13 + $0x108] sm:$0xff] }
  0x79   : > { %538 = vmatprep.subr.mxu0 %v465_v25  ;;  %1123 = vmatprep.subr.mxu1 %v465_v25  ;;  %v486_v4 = vld [vmem:[%s1694_s13 + $0x100] sm:$0xff]  ;;  %v447_v5 = vld [vmem:[%s1692_s16 + $0x8] sm:$0xff]  ;;  %v449_v6 = vld [vmem:[%s1692_s16 + $0x18] sm:$0xff] }
  0x7a   : > { %539 = vmatpush1.msra.mxu0 %v464_v26  ;;  %1155 = vmatpush1.msra.mxu1 %v464_v26  ;;  %v1794_v7 = vld [vmem:[%s1692_s16] sm:$0xff]  ;;  %v1797_v8 = vld [vmem:[%s1692_s16 + $0x10] sm:$0xff]  ;;  %v452_v10 = vld [vmem:[#allocation2 + $0x18] sm:$0xff] }
  0x7b   : > { %540 = vmatprep.subr.mxu0 %v463_v27  ;;  %1124 = vmatprep.subr.mxu1 %v463_v27  ;;  %v450_v9 = vld [vmem:[#allocation2 + $0x10] sm:$0xff]  ;;  %v451_v13 = vld [vmem:[#allocation2] sm:$0xff]  ;;  %v453_v14 = vld [vmem:[#allocation2 + $0x8] sm:$0xff] }
  0x7c   : > { %541 = vmatpush1.msra.mxu0 %v462_v28  ;;  %1156 = vmatpush1.msra.mxu1 %v462_v28 }
  0x7d   : > { %542 = vmatprep.subr.mxu0 %v461_v29  ;;  %1125 = vmatprep.subr.mxu1 %v461_v29 }
  0x7e   : > { %543 = vmatpush1.msra.mxu0 %v460_v30  ;;  %1157 = vmatpush1.msra.mxu1 %v460_v30 }
  0x7f   : > { %544 = vmatprep.subr.mxu0 %v459_v31  ;;  %1126 = vmatprep.subr.mxu1 %v459_v31 }
  0x80   : > { %545 = vmatpush1.msra.mxu0 %v458_v32  ;;  %1158 = vmatpush1.msra.mxu1 %v458_v32 }
  0x81   : > { %546 = vmatprep.subr.mxu0 %v457_v33  ;;  %1127 = vmatprep.subr.mxu1 %v457_v33 }
  0x82   : > { %547 = vmatpush1.msra.mxu0 %v456_v34  ;;  %1159 = vmatpush1.msra.mxu1 %v456_v34 }
  0x83   : > { %548 = vmatprep.subr.mxu0 %v455_v35  ;;  %1128 = vmatprep.subr.mxu1 %v455_v35 }
  0x84   : > { %549 = vmatpush1.msra.mxu0 %v454_v36  ;;  %1160 = vmatpush1.msra.mxu1 %v454_v36 }
  0x85   : > { %550 = vmatprep.subr.mxu0 %v517_v37  ;;  %1129 = vmatprep.subr.mxu1 %v517_v37 }
  0x86   : > { %551 = vmatpush2.msra.mxu0 %v516_v38  ;;  %1161 = vmatpush2.msra.mxu1 %v516_v38 }
  0x87   : > { %552 = vmatprep.subr.mxu0 %v515_v39  ;;  %1130 = vmatprep.subr.mxu1 %v515_v39 }
  0x88   : > { %553 = vmatpush2.msra.mxu0 %v514_v40  ;;  %1162 = vmatpush2.msra.mxu1 %v514_v40 }
  0x89   : > { %554 = vmatprep.subr.mxu0 %v513_v41  ;;  %1131 = vmatprep.subr.mxu1 %v513_v41 }
  0x8a   : > { %555 = vmatpush2.msra.mxu0 %v512_v42  ;;  %1163 = vmatpush2.msra.mxu1 %v512_v42 }
  0x8b   : > { %556 = vmatprep.subr.mxu0 %v511_v43  ;;  %1132 = vmatprep.subr.mxu1 %v511_v43 }
  0x8c   : > { %557 = vmatpush2.msra.mxu0 %v510_v44  ;;  %1164 = vmatpush2.msra.mxu1 %v510_v44 }
  0x8d   : > { %558 = vmatprep.subr.mxu0 %v509_v45  ;;  %1133 = vmatprep.subr.mxu1 %v509_v45 }
  0x8e   : > { %559 = vmatpush2.msra.mxu0 %v508_v46  ;;  %1165 = vmatpush2.msra.mxu1 %v508_v46 }
  0x8f   : > { %560 = vmatprep.subr.mxu0 %v507_v47  ;;  %1134 = vmatprep.subr.mxu1 %v507_v47 }
  0x90   : > { %561 = vmatpush2.msra.mxu0 %v506_v48  ;;  %1166 = vmatpush2.msra.mxu1 %v506_v48 }
  0x91   : > { %562 = vmatprep.subr.mxu0 %v505_v49  ;;  %1135 = vmatprep.subr.mxu1 %v505_v49 }
  0x92   : > { %563 = vmatpush2.msra.mxu0 %v504_v50  ;;  %1167 = vmatpush2.msra.mxu1 %v504_v50 }
  0x93   : > { %564 = vmatprep.subr.mxu0 %v503_v51  ;;  %1136 = vmatprep.subr.mxu1 %v503_v51 }
  0x94   : > { %565 = vmatpush2.msra.mxu0 %v502_v52  ;;  %1168 = vmatpush2.msra.mxu1 %v502_v52 }
  0x95   : > { %566 = vmatprep.subr.mxu0 %v501_v53  ;;  %1137 = vmatprep.subr.mxu1 %v501_v53 }
  0x96   : > { %567 = vmatpush2.msra.mxu0 %v500_v54  ;;  %1169 = vmatpush2.msra.mxu1 %v500_v54 }
  0x97   : > { %568 = vmatprep.subr.mxu0 %v499_v55  ;;  %1138 = vmatprep.subr.mxu1 %v499_v55 }
  0x98   : > { %569 = vmatpush2.msra.mxu0 %v498_v56  ;;  %1170 = vmatpush2.msra.mxu1 %v498_v56 }
  0x99   : > { %570 = vmatprep.subr.mxu0 %v497_v57  ;;  %1139 = vmatprep.subr.mxu1 %v497_v57 }
  0x9a   : > { %571 = vmatpush2.msra.mxu0 %v496_v58  ;;  %1171 = vmatpush2.msra.mxu1 %v496_v58 }
  0x9b   : > { %572 = vmatprep.subr.mxu0 %v495_v59  ;;  %1140 = vmatprep.subr.mxu1 %v495_v59 }
  0x9c   : > { %573 = vmatpush2.msra.mxu0 %v494_v60  ;;  %1172 = vmatpush2.msra.mxu1 %v494_v60 }
  0x9d   : > { %574 = vmatprep.subr.mxu0 %v493_v61  ;;  %1141 = vmatprep.subr.mxu1 %v493_v61 }
  0x9e   : > { %575 = vmatpush2.msra.mxu0 %v492_v62  ;;  %1173 = vmatpush2.msra.mxu1 %v492_v62 }
  0x9f   : > { %576 = vmatprep.subr.mxu0 %v491_v63  ;;  %1142 = vmatprep.subr.mxu1 %v491_v63 }
  0xa0   : > { %577 = vmatpush2.msra.mxu0 %v490_v0  ;;  %1174 = vmatpush2.msra.mxu1 %v490_v0 }
  0xa1   : > { %578 = vmatprep.subr.mxu0 %v489_v1  ;;  %1143 = vmatprep.subr.mxu1 %v489_v1 }
  0xa2   : > { %579 = vmatpush2.msra.mxu0 %v488_v2  ;;  %1175 = vmatpush2.msra.mxu1 %v488_v2 }
  0xa3   : > { %580 = vmatprep.subr.mxu0 %v487_v3  ;;  %1144 = vmatprep.subr.mxu1 %v487_v3 }
  0xa4   : > { %581 = vmatpush2.msra.mxu0 %v486_v4  ;;  %1176 = vmatpush2.msra.mxu1 %v486_v4 }
  0xa5   : > { %582 = vmatprep.mubr.f32.mxu0 %v447_v5  ;;  %588 = vmatprep.mubr.f32.mxu1 %v449_v6 }
  0xa6   : > { %583 = vmatmul.mubr.f32.vlgmr.msra.gmra.mxu0 %v1794_v7  ;;  %589 = vmatmul.mubr.f32.vlgmr.msra.gmra.mxu1 %v1797_v8 }
 0x166   : > { %v584_v11 = vpop.f32.mrf.mxu0  ;;  %v590_v12 = vpop.f32.mrf.mxu1 }
 0x167   : > { %v595_v15 = vadd.f32 %v584_v11, %v450_v9  ;;  %v597_v16 = vadd.f32 %v590_v12, %v452_v10  ;;  %606 = sbr.rel (%p1061_p8) target bundleno = 614 (0x266), region = 79 }
 0x168   : > { %v586_v17 = vpop.f32.mrf.mxu0  ;;  %v592_v18 = vpop.f32.mrf.mxu1 }
 0x169   : > { %599 = vst [vmem:[#allocation2 + $0x10] sm:$0xff] %v595_v15  ;;  %601 = vst [vmem:[#allocation2 + $0x18] sm:$0xff] %v597_v16  ;;  %v596_v19 = vadd.f32 %v586_v17, %v451_v13  ;;  %v598_v20 = vadd.f32 %v592_v18, %v453_v14 }
 0x16b   : > { %600 = vst [vmem:[#allocation2] sm:$0xff] %v596_v19  ;;  %602 = vst [vmem:[#allocation2 + $0x8] sm:$0xff] %v598_v20 }
 0x16c   : > { %609 = sbr.rel (%p1060_p12) target bundleno = 371 (0x173), region = 83 }
 0x171   : > { %vm610_vm0 = vcmask 64512   ;;  %v1502_v21 = vmov 0.0  }
 0x172   : > { %611 = vst.msk [vmem:[#allocation3] sm:$0xff] %vm610_vm0, %v1502_v21  ;;  %612 = vst.msk [vmem:[#allocation3 + $0x8] sm:$0xff] %vm610_vm0, %v1502_v21 }
 0x173 PF: > { %v646_v22 = vld [vmem:[%s1720_s8 + $0xf8] sm:$0xff]  ;;  %v645_v24 = vld [vmem:[%s1720_s8 + $0xf0] sm:$0xff]  ;;  %711 = vmatprep.mubr.f32.mxu0 %v447_v5  ;;  %716 = vmatprep.mubr.f32.mxu1 %v449_v6  ;;  %v644_v26 = vld [vmem:[%s1720_s8 + $0xe8] sm:$0xff]  ;;  %vm724_vm1 = vcmask 64512   ;;  %p1063_p9 = scmp.ne.s32.totalorder %s1479_s29, 1 }
 0x174   : > { %v630_v23 = vld [vmem:[%s1720_s8 + $0x78] sm:$0xff]  ;;  %1075 = vmatprep.subr.mxu0 %v646_v22  ;;  %1177 = vmatprep.subr.mxu1 %v646_v22  ;;  %v629_v25 = vld [vmem:[%s1720_s8 + $0x70] sm:$0xff]  ;;  %v628_v27 = vld [vmem:[%s1720_s8 + $0x68] sm:$0xff]  ;;  %s1976_s13 = sld [smem:[#allocation22_spill]] (!%p1063_p9) }
 0x175   : > { %1076 = vmatpush3.msra.mxu0 %v630_v23  ;;  %1193 = vmatpush3.msra.mxu1 %v630_v23  ;;  %v643_v28 = vld [vmem:[%s1720_s8 + $0xe0] sm:$0xff]  ;;  %v642_v30 = vld [vmem:[%s1720_s8 + $0xd8] sm:$0xff]  ;;  %v641_v32 = vld [vmem:[%s1720_s8 + $0xd0] sm:$0xff] }
 0x176   : > { %1077 = vmatprep.subr.mxu0 %v645_v24  ;;  %1178 = vmatprep.subr.mxu1 %v645_v24  ;;  %v627_v29 = vld [vmem:[%s1720_s8 + $0x60] sm:$0xff]  ;;  %v626_v31 = vld [vmem:[%s1720_s8 + $0x58] sm:$0xff]  ;;  %v625_v33 = vld [vmem:[%s1720_s8 + $0x50] sm:$0xff] }
 0x177   : > { %1078 = vmatpush3.msra.mxu0 %v629_v25  ;;  %1194 = vmatpush3.msra.mxu1 %v629_v25  ;;  %v640_v34 = vld [vmem:[%s1720_s8 + $0xc8] sm:$0xff]  ;;  %v639_v36 = vld [vmem:[%s1720_s8 + $0xc0] sm:$0xff]  ;;  %v638_v38 = vld [vmem:[%s1720_s8 + $0xb8] sm:$0xff] }
 0x178   : > { %1079 = vmatprep.subr.mxu0 %v644_v26  ;;  %1179 = vmatprep.subr.mxu1 %v644_v26  ;;  %v624_v35 = vld [vmem:[%s1720_s8 + $0x48] sm:$0xff]  ;;  %v623_v37 = vld [vmem:[%s1720_s8 + $0x40] sm:$0xff]  ;;  %v622_v39 = vld [vmem:[%s1720_s8 + $0x38] sm:$0xff] }
 0x179   : > { %1080 = vmatpush3.msra.mxu0 %v628_v27  ;;  %1195 = vmatpush3.msra.mxu1 %v628_v27  ;;  %v637_v40 = vld [vmem:[%s1720_s8 + $0xb0] sm:$0xff]  ;;  %v636_v42 = vld [vmem:[%s1720_s8 + $0xa8] sm:$0xff]  ;;  %v635_v44 = vld [vmem:[%s1720_s8 + $0xa0] sm:$0xff] }
 0x17a   : > { %1081 = vmatprep.subr.mxu0 %v643_v28  ;;  %1180 = vmatprep.subr.mxu1 %v643_v28  ;;  %v621_v41 = vld [vmem:[%s1720_s8 + $0x30] sm:$0xff]  ;;  %v620_v43 = vld [vmem:[%s1720_s8 + $0x28] sm:$0xff]  ;;  %v619_v45 = vld [vmem:[%s1720_s8 + $0x20] sm:$0xff] }
 0x17b   : > { %1082 = vmatpush3.msra.mxu0 %v627_v29  ;;  %1196 = vmatpush3.msra.mxu1 %v627_v29  ;;  %v634_v46 = vld [vmem:[%s1720_s8 + $0x98] sm:$0xff]  ;;  %v633_v48 = vld [vmem:[%s1720_s8 + $0x90] sm:$0xff]  ;;  %v632_v50 = vld [vmem:[%s1720_s8 + $0x88] sm:$0xff] }
 0x17c   : > { %1083 = vmatprep.subr.mxu0 %v642_v30  ;;  %1181 = vmatprep.subr.mxu1 %v642_v30  ;;  %v618_v47 = vld [vmem:[%s1720_s8 + $0x18] sm:$0xff]  ;;  %v617_v49 = vld [vmem:[%s1720_s8 + $0x10] sm:$0xff]  ;;  %v616_v51 = vld [vmem:[%s1720_s8 + $0x8] sm:$0xff] }
 0x17d   : > { %1084 = vmatpush3.msra.mxu0 %v626_v31  ;;  %1197 = vmatpush3.msra.mxu1 %v626_v31  ;;  %v631_v52 = vld [vmem:[%s1720_s8 + $0x80] sm:$0xff]  ;;  %v614_v58 = vld [vmem:[#allocation3 + $0x8] sm:$0xff] }
 0x17e   : > { %1085 = vmatprep.subr.mxu0 %v641_v32  ;;  %1182 = vmatprep.subr.mxu1 %v641_v32  ;;  %v615_v53 = vld [vmem:[%s1720_s8] sm:$0xff] }
 0x17f   : > { %1086 = vmatpush3.msra.mxu0 %v625_v33  ;;  %1198 = vmatpush3.msra.mxu1 %v625_v33  ;;  %v613_v56 = vld [vmem:[#allocation3] sm:$0xff] }
 0x180   : > { %1087 = vmatprep.subr.mxu0 %v640_v34  ;;  %1183 = vmatprep.subr.mxu1 %v640_v34 }
 0x181   : > { %1088 = vmatpush3.msra.mxu0 %v624_v35  ;;  %1199 = vmatpush3.msra.mxu1 %v624_v35 }
 0x182   : > { %1089 = vmatprep.subr.mxu0 %v639_v36  ;;  %1184 = vmatprep.subr.mxu1 %v639_v36 }
 0x183   : > { %1090 = vmatpush3.msra.mxu0 %v623_v37  ;;  %1200 = vmatpush3.msra.mxu1 %v623_v37 }
 0x184   : > { %1091 = vmatprep.subr.mxu0 %v638_v38  ;;  %1185 = vmatprep.subr.mxu1 %v638_v38 }
 0x185   : > { %1092 = vmatpush3.msra.mxu0 %v622_v39  ;;  %1201 = vmatpush3.msra.mxu1 %v622_v39 }
 0x186   : > { %1093 = vmatprep.subr.mxu0 %v637_v40  ;;  %1186 = vmatprep.subr.mxu1 %v637_v40 }
 0x187   : > { %1094 = vmatpush3.msra.mxu0 %v621_v41  ;;  %1202 = vmatpush3.msra.mxu1 %v621_v41 }
 0x188   : > { %1095 = vmatprep.subr.mxu0 %v636_v42  ;;  %1187 = vmatprep.subr.mxu1 %v636_v42 }
 0x189   : > { %1096 = vmatpush3.msra.mxu0 %v620_v43  ;;  %1203 = vmatpush3.msra.mxu1 %v620_v43 }
 0x18a   : > { %1097 = vmatprep.subr.mxu0 %v635_v44  ;;  %1188 = vmatprep.subr.mxu1 %v635_v44 }
 0x18b   : > { %1098 = vmatpush3.msra.mxu0 %v619_v45  ;;  %1204 = vmatpush3.msra.mxu1 %v619_v45 }
 0x18c   : > { %1099 = vmatprep.subr.mxu0 %v634_v46  ;;  %1189 = vmatprep.subr.mxu1 %v634_v46 }
 0x18d   : > { %1100 = vmatpush3.msra.mxu0 %v618_v47  ;;  %1205 = vmatpush3.msra.mxu1 %v618_v47 }
 0x18e   : > { %1101 = vmatprep.subr.mxu0 %v633_v48  ;;  %1190 = vmatprep.subr.mxu1 %v633_v48 }
 0x18f   : > { %1102 = vmatpush3.msra.mxu0 %v617_v49  ;;  %1206 = vmatpush3.msra.mxu1 %v617_v49 }
 0x190   : > { %1103 = vmatprep.subr.mxu0 %v632_v50  ;;  %1191 = vmatprep.subr.mxu1 %v632_v50 }
 0x191   : > { %1104 = vmatpush3.msra.mxu0 %v616_v51  ;;  %1207 = vmatpush3.msra.mxu1 %v616_v51 }
 0x192   : > { %1105 = vmatprep.subr.mxu0 %v631_v52  ;;  %1192 = vmatprep.subr.mxu1 %v631_v52 }
 0x193   : > { %1106 = vmatpush3.msra.mxu0 %v615_v53  ;;  %1208 = vmatpush3.msra.mxu1 %v615_v53 }
 0x194   : > { %712 = vmatmul.mubr.f32.vlgmr.msra.gmra.mxu0 %v1794_v7  ;;  %717 = vmatmul.mubr.f32.vlgmr.msra.gmra.mxu1 %v1797_v8 }
 0x254   : > { %v1107_v54 = vpop.f32.mrf.mxu0  ;;  %v1110_v55 = vpop.f32.mrf.mxu1 }
 0x256   : > { %v1108_v57 = vpop.f32.mrf.mxu0  ;;  %v1111_v59 = vpop.f32.mrf.mxu1 }
 0x257   : > { %v1109_v60 = vadd.f32 %v1108_v57, %v1107_v54  ;;  %v1112_v61 = vadd.f32 %v1111_v59, %v1110_v55  ;;  %730 = sbr.rel (%p1063_p9) target bundleno = 614 (0x266), region = 87 }
 0x259   : > { %v722_v62 = vadd.f32 %v1109_v60, %v613_v56  ;;  %v723_v63 = vadd.f32 %v1112_v61, %v614_v58 }
 0x25b   : > { %725 = vst.msk [vmem:[#allocation3] sm:$0xff] %vm724_vm1, %v722_v62  ;;  %726 = vst.msk [vmem:[#allocation3 + $0x8] sm:$0xff] %vm724_vm1, %v723_v63 }
 0x25c   : > { %v733_v1 = vld [vmem:[%s1976_s13] sm:$0xff]  ;;  %v734_v4 = vld [vmem:[%s1976_s13 + $0x8] sm:$0xff] }
 0x262   : > { %v731_v0 = vld [vmem:[#allocation3] sm:$0xff]  ;;  %v732_v2 = vld [vmem:[#allocation3 + $0x8] sm:$0xff] }
 0x263   : > { %v735_v3 = vmul.f32 %v733_v1, %v731_v0  ;;  %v736_v5 = vmul.f32 %v734_v4, %v732_v2 }
 0x265   : > { %737 = vst.msk [vmem:[#allocation3] sm:$0xff] %vm724_vm1, %v735_v3  ;;  %738 = vst.msk [vmem:[#allocation3 + $0x8] sm:$0xff] %vm724_vm1, %v736_v5 }
 0x266 PF: > { %p1064_p10 = scmp.ne.s32.totalorder %s1479_s29, 1 }
 0x268   : > { %742 = sbr.rel (%p1064_p10) target bundleno = 825 (0x339), region = 91 }
 0x26d   : > { %v746_v6 = vld [vmem:[%s1715_s28 + $0x8] sm:$0xff]  ;;  %v745_v7 = vld [vmem:[%s1715_s28] sm:$0xff]  ;;  %vm747_vm2 = vcmask 64512   ;;  %v1503_v10 = vmov 0.0   ;;  %v841_v11 = vlaneseq  ;;  %v831_v16 = vld [vmem:[#allocation2 + $0x10] sm:$0xff] }
 0x26e   : > { %784 = vmatprep.subr.mxu0 %v746_v6  ;;  %1209 = vmatprep.subr.mxu1 %v746_v6  ;;  %v743_v8 = vld [vmem:[#allocation3] sm:$0xff]  ;;  %v744_v9 = vld [vmem:[#allocation3 + $0x8] sm:$0xff]  ;;  %v833_v17 = vld [vmem:[#allocation2 + $0x18] sm:$0xff] }
 0x26f   : > { %785 = vmatpush1.msra.mxu0 %v745_v7  ;;  %1210 = vmatpush1.msra.mxu1 %v745_v7  ;;  %v842_v12 = vshrl.u32 %v841_v11, 7  ;;  %v839_v14 = vld [vmem:[%s416_s3] sm:$0x3]  ;;  %v834_v22 = vld [vmem:[#allocation2 + $0x8] sm:$0xff] }
 0x270   : > { %818 = vmatprep.mubr.f32.mxu0 %v1503_v10  ;;  %824 = vmatprep.mubr.f32.mxu1 %v1503_v10  ;;  %v832_v21 = vld [vmem:[#allocation2] sm:$0xff] }
 0x271   : > { %1065 = vmatmul.mubr.msk.f32.vlgmr.msra.gmra.mxu0 %vm747_vm2, %v743_v8  ;;  %1066 = vmatmul.mubr.msk.f32.vlgmr.msra.gmra.mxu1 %vm747_vm2, %v744_v9  ;;  %v843_v13 = vsub.s32 0, %v842_v12  ;;  %v847_v15 = vsub.s32 1, %v842_v12 }
 0x273   : > { %v844_v18 = vrot.slane %v839_v14, %v843_v13  ;;  %v848_v25 = vrot.slane %v839_v14, %v847_v15 }
 0x331   : > { %v820_v19 = vpop.f32.mrf.mxu0  ;;  %v826_v20 = vpop.f32.mrf.mxu1 }
 0x332   : > { %v835_v23 = vadd.f32 %v831_v16, %v820_v19  ;;  %v837_v24 = vadd.f32 %v833_v17, %v826_v20 }
 0x333   : > { %v822_v26 = vpop.f32.mrf.mxu0  ;;  %v828_v27 = vpop.f32.mrf.mxu1 }
 0x334   : > { %v851_v28 = vadd.f32 %v844_v18, %v835_v23  ;;  %v853_v29 = vadd.f32 %v844_v18, %v837_v24  ;;  %v836_v30 = vadd.f32 %v832_v21, %v822_v26  ;;  %v838_v31 = vadd.f32 %v834_v22, %v828_v27 }
 0x336   : > { %855 = vst [vmem:[%s1722_s11] sm:$0xff] %v851_v28  ;;  %857 = vst [vmem:[%s1722_s11 + $0x10] sm:$0xff] %v853_v29  ;;  %v852_v32 = vadd.f32 %v848_v25, %v836_v30  ;;  %v854_v33 = vadd.f32 %v848_v25, %v838_v31 }
 0x338   : > { %856 = vst [vmem:[%s1722_s11 + $0x8] sm:$0xff] %v852_v32  ;;  %858 = vst [vmem:[%s1722_s11 + $0x18] sm:$0xff] %v854_v33 }
 0x339 PF: > { %s1074_s20 = sshll.u32 %s1483_s30, 8  ;;  %s1977_s19 = sld [smem:[#allocation23_spill]] }
 0x33a   : > { %s876_s6 = sshll.u32 %s1722_s11, 4  ;;  %s1868_s28 = scalar_lea.sflag [#allocation7], %s406_s23  ;;  %s1864_s6 = int_to_ptr.vmem [resolvable:$true] %s876_s6 }
 0x33b   : > { %s1359_s14 = scalar_lea.vmem %s1864_s6, 512  ;;  %s1504_s30 = smov [#allocation8]  }
 0x33c   : > { %p1360_p11 = scmp.ne.s32.totalorder %s1864_s6, %s1359_s14  ;;  %s1363_s0 = sshll.u32 %s1504_s30, 4  ;;  %s1364_s0 = int_to_ptr.vmem [resolvable:$false] %s1363_s0 }
 0x33d   : > { %s1365_s26 = scalar_lea.vmem %s1364_s0, 1024  ;;  %p1366_p1 = scmp.lt.s32.totalorder %s1864_s6, %s1364_s0 }
 0x33e   : > { %p1361_p13 = pnand %p1360_p11, %p1662_p4  ;;  %p1367_p2 = scmp.lt.s32.totalorder %s1365_s26, %s1359_s14 }
 0x33f   : > { %s1861_s18 = scalar_lea.hbm %s1977_s19, %s1074_s20 }
 0x340   : > { %p1362_p0 = pneg %p1361_p13  ;;  %p1368_p6 = por %p1367_p2, %p1366_p1 }
 0x342   : > { %p1369_p7 = pnand %p1368_p6, %p1362_p0 }
 0x344   : > { %1372 = shalt.err (!%p1369_p7)
}
 0x345   : > { %s1373_s23 = scalar_lea.hbm %s1861_s18, 512  ;;  %s1377_s16 = scalar_lea.hbm %s1977_s19, 1024 }
 0x346   : > { %p1374_p3 = scmp.ne.s32.totalorder %s1861_s18, %s1373_s23  ;;  %p1378_p9 = scmp.lt.s32.totalorder %s1861_s18, %s1977_s19 }
 0x347   : > { %p1379_p10 = scmp.lt.s32.totalorder %s1377_s16, %s1373_s23 }
 0x348   : > { %p1375_p12 = pnand %p1374_p3, %p1662_p4 }
 0x349   : > { %p1380_p11 = por %p1379_p10, %p1378_p9 }
 0x34a   : > { %p1376_p8 = pneg %p1375_p12 }
 0x34c   : > { %p1381_p13 = pnand %p1380_p11, %p1376_p8 }
 0x34e   : > { %1384 = shalt.err (!%p1381_p13)
}
 0x34f   : > { %s1505_s12 = smov 256   ;;  %s1506_s29 = smov 512  }
 0x350   : > { %s1507_s17 = smov 16  }
 0x351   : > { %1213 = dma.vmem_to_hbm [thread:$0]  (%p1662_p4), %s1864_s6, 512, %s1861_s18, %s1868_s28, %s1505_s12, %s1506_s29, %s1507_s17  }
 0x352 PF: > { %p1219_p0 = scmp.ge.s32.totalorder %s1495_s9, 2  ;;  %s891_s15 = sand.u32 1, %s1447_s21  }
 0x353   : > { %s892_s3 = scalar_lea.sflag [#allocation7], %s891_s15 }
 0x354   : > { %p1216_p1 = pnand %p1219_p0, %p1666_p5 }
 0x356   : > { %p1217_p2 = pneg %p1216_p1 }
 0x358   : > { %1442 = dma.done.wait (%p1217_p2), %s892_s3, 512  }
 0x359   : > { %1444 = vsyncadd (%p1217_p2), %s892_s3, 4294966784  ;;  %s22_s9 = sadd.s32 1, %s1495_s9   ;;  %s1980_s24 = sld [smem:[#allocation11_spill]] }
 0x35a   : > { %p1896_p6 = scmp.ge.s32.totalorder %s22_s9, 6   ;;  %s1981_s23 = sld [smem:[#allocation19_spill]] }
 0x35b   : > { %s1982_s18 = sld [smem:[#allocation12_spill]]  ;;  %s1989_s21 = smov %s1451_s22 }
 0x35c   : > { %s1983_s26 = sld [smem:[#allocation18_spill]]  ;;  %s1993_s29 = smov %s1487_s7 }
 0x35d   : > { %s1984_s27 = sld [smem:[#allocation13_spill]] }
 0x35e   : > { %s1985_s28 = sld [smem:[#allocation17_spill]] }
 0x35f   : > { %s1986_s30 = sld [smem:[#allocation14_spill]]  ;;  %s1990_s22 = smov %s1980_s24 }
 0x360   : > { %s1987_s6 = sld [smem:[#allocation15_spill]]  ;;  %s1991_s24 = smov %s1463_s25 }
 0x361   : > { %s1988_s8 = sld [smem:[#allocation16_spill]]  ;;  %s1992_s25 = smov %s1982_s18 }
 0x362   :  { %21 = sbr.rel (!%p1896_p6) target bundleno = 14 (0xe), region = 152 }
 0x366   : > { %s1994_s7 = smov %s1987_s6 }
 0x367   :  { %897 = vsyncpa [#allocation6], 1 }
 0x368   :  { %899 = vsyncpa [#allocation6 + $0x1], 1 }
 0x369   :  { %900 = vsyncpa [#allocation7], 1 }
 0x36a   :  { %902 = vsyncpa [#allocation7 + $0x1], 1 }

</bundles_post_ra>
